<compile_context>
chip_gen: v5e
topology: v5e:2x2
jax: 0.10.0
libtpu: 0.0.40
codegen_flags: <defaults>
</compile_context>

<pallas_src>
import functools

import jax
import jax.numpy as jnp
from jax.experimental import pallas as pl
from jax.experimental.pallas import tpu as pltpu


def _ccam_kernel(x_ref, y_ref, z_ref, wx_ref, wy_ref, wz_ref, b_ref, o_ref,
                 *, C, Nb, HW, stream_prec):
    """Fused CCAM for Nb batches: GAP -> fc(+folded conv1d) -> softmax -> mix."""
    f32 = jnp.float32
    hi = jax.lax.Precision.HIGHEST
    C3 = 3 * C
    inv_hw = f32(1.0 / HW)

    # ---- GAP: lane-axis sums on the VPU/XLU, exact f32 accumulation.  Keeps
    #      the MXU free (no M=1 ones-row matmul).
    gx = jnp.sum(x_ref[...].astype(f32), axis=2) * inv_hw        # (Nb, C)
    gy = jnp.sum(y_ref[...].astype(f32), axis=2) * inv_hw        # (Nb, C)
    gz = jnp.sum(z_ref[...].astype(f32), axis=2) * inv_hw        # (Nb, C)

    # ---- fc (+ conv1d folded into the weights by the wrapper).  The weight is
    #      pre-split by gap source, so no in-kernel concat / slicing of gaps.
    fc = (jnp.dot(gx, wx_ref[...], preferred_element_type=f32, precision=hi)
          + jnp.dot(gy, wy_ref[...], preferred_element_type=f32, precision=hi)
          + jnp.dot(gz, wz_ref[...], preferred_element_type=f32, precision=hi)
          + b_ref[...])                                          # (Nb, L) f32

    # ---- softmax over the 3C "source channel" axis.  The wrapper permuted the
    #      fc columns to j = m*3C + c, so one small reshape lands the softmax
    #      axis on lanes (no scratch round-trip, no copy loop, no transpose).
    a = fc.reshape(Nb, C, C3)                                    # (Nb, C, 3C)
    a = a - jnp.max(a, axis=2, keepdims=True)
    e = jnp.exp(a)
    p = e / jnp.sum(e, axis=2, keepdims=True)                    # (Nb, C, 3C) f32

    # Static lane slices, hoisted out of the per-batch loop.
    px = p[:, :, 0:C]            # weights applied to x
    py = p[:, :, C:2 * C]        # weights applied to y
    pz = p[:, :, 2 * C:3 * C]    # weights applied to z

    # ---- channel mix: out[b] = px[b] @ x[b] + py[b] @ y[b] + pz[b] @ z[b].
    #      Plain NN MXU matmuls; the feature maps stream in their input dtype.
    for b in range(Nb):          # Nb <= 8: cheap static unroll
        acc = jnp.dot(px[b].astype(x_ref.dtype), x_ref[b],
                      preferred_element_type=f32, precision=stream_prec)
        acc = acc + jnp.dot(py[b].astype(y_ref.dtype), y_ref[b],
                            preferred_element_type=f32, precision=stream_prec)
        acc = acc + jnp.dot(pz[b].astype(z_ref.dtype), z_ref[b],
                            preferred_element_type=f32, precision=stream_prec)
        o_ref[b] = acc.astype(o_ref.dtype)


def ccam_forward(x, y, z, params):
    N, C, H, W = x.shape
    C3, L, HW = 3 * C, 3 * C * C, H * W
    f32 = jnp.float32

    # Pure views (no copy, no HBM concatenate): (N, C, H, W) -> (N, C, HW).
    x2 = x.reshape(N, C, HW)
    y2 = y.reshape(N, C, HW)
    z2 = z.reshape(N, C, HW)

    # ---- parameter preprocessing (plain JAX, O(L*3C)) -----------------------
    # Fold the linear k=3 / pad=1 conv1d into the fc:
    #   conv1d(W @ gap + b) + cb == band(W) @ gap + (band(b) + cb)
    w = params["fc_w"].astype(f32)                 # (L, 3C), row index l = c*C+m
    b = params["fc_b"].astype(f32)                 # (L,)
    t = params["conv_w"].reshape(3).astype(f32)
    cb = params["conv_b"].reshape(()).astype(f32)

    def band(v):  # 3-tap conv along axis 0 with zero padding (cross-correlation)
        vp = jnp.pad(v, ((1, 1),) + ((0, 0),) * (v.ndim - 1))
        return t[0] * vp[:-2] + t[1] * vp[1:-1] + t[2] * vp[2:]

    w_eff = band(w)                                # (L, 3C)
    b_eff = band(b) + cb                           # (L,)

    # Permute fc columns from l = c*C + m to j = m*3C + c so the in-kernel
    # reshape puts the softmax (c, size 3C) axis on lanes, and split the weight
    # by gap source (x / y / z).
    wt = w_eff.T.reshape(C3, C3, C).transpose(0, 2, 1).reshape(C3, L)  # (3C_k, L)
    bias = b_eff.reshape(C3, C).T.reshape(1, L)                         # (1, L)
    wx, wy, wz = wt[0:C], wt[C:2 * C], wt[2 * C:3 * C]                  # (C, L) each

    # f32 inputs keep HIGHEST on the mix matmuls (module fidelity / 1e-3 check);
    # bf16 inputs take the single-pass bf16 MXU path with f32 accumulation.
    stream_prec = (jax.lax.Precision.HIGHEST if x.dtype == jnp.float32
                   else jax.lax.Precision.DEFAULT)

    # ---- batch blocking: Nb batches per grid step, bounded by a VMEM budget.
    itemsize = jnp.dtype(x.dtype).itemsize

    def vmem_need(nb_):
        m_io = 2 * 4 * nb_ * C * HW * itemsize     # x, y, z, out (double-buffered)
        wts = 2 * (3 * C * L + L) * 4              # wx, wy, wz, bias (f32)
        return m_io + wts

    nb = 1
    for cand in (8, 4, 2):
        if N % cand == 0:
            nb = cand
            break
    while nb > 1 and vmem_need(nb) > (48 << 20):
        nb //= 2
    # At very large C*HW even nb=1 would not fit VMEM; the fallback there is an
    # HW-tiled two-phase kernel (GAP accumulated over an 'arbitrary' grid axis).

    cp = {"dimension_semantics": ("parallel",)}
    need = vmem_need(nb) + (2 << 20)
    if need > (16 << 20):
        cp["vmem_limit_bytes"] = int(min(need, 100 << 20))

    kernel = functools.partial(_ccam_kernel, C=C, Nb=nb, HW=HW,
                               stream_prec=stream_prec)

    out = pl.pallas_call(
        kernel,
        out_shape=jax.ShapeDtypeStruct((N, C, HW), x.dtype),
        grid=(N // nb,),
        in_specs=[
            pl.BlockSpec((nb, C, HW), lambda i: (i, 0, 0)),   # x slab
            pl.BlockSpec((nb, C, HW), lambda i: (i, 0, 0)),   # y slab
            pl.BlockSpec((nb, C, HW), lambda i: (i, 0, 0)),   # z slab
            pl.BlockSpec((C, L), lambda i: (0, 0)),           # wx (grid-invariant)
            pl.BlockSpec((C, L), lambda i: (0, 0)),           # wy (grid-invariant)
            pl.BlockSpec((C, L), lambda i: (0, 0)),           # wz (grid-invariant)
            pl.BlockSpec((1, L), lambda i: (0, 0)),           # bias (grid-invariant)
        ],
        out_specs=pl.BlockSpec((nb, C, HW), lambda i: (i, 0, 0)),
        compiler_params=pltpu.CompilerParams(**cp),
    )(x2, y2, z2, wx, wy, wz, bias)

    return out.reshape(N, C, H, W)


def ccam_reference(x, y, z, params):
    # Pure-JAX f32 reference of the PyTorch forward.
    m = jnp.concatenate([x, y, z], axis=1).astype(jnp.float32)
    N, C3, H, W = m.shape
    C = C3 // 3
    gap = jnp.mean(m, axis=(2, 3))                                      # (N, 3C)
    fc_out = jnp.dot(gap, params["fc_w"].T.astype(jnp.float32),
                     precision="highest") + params["fc_b"]
    w3 = params["conv_w"].reshape(3)
    padded = jnp.pad(fc_out, ((0, 0), (1, 1)))
    conv = (w3[0] * padded[:, :-2] + w3[1] * padded[:, 1:-1]
            + w3[2] * padded[:, 2:]) + params["conv_b"][0]
    a = conv.reshape(N, C3, C)
    p = jax.nn.softmax(a, axis=1)
    return jnp.einsum("nchw,ncm->nmhw", m, p, precision="highest")


if __name__ == "__main__":
    key = jax.random.PRNGKey(0)
    N, C, H, W = 2, 4, 16, 16          # inchannels = 4
    C3, L = 3 * C, 3 * C * C
    ks = jax.random.split(key, 7)
    x = jax.random.normal(ks[0], (N, C, H, W), jnp.float32)
    y = jax.random.normal(ks[1], (N, C, H, W), jnp.float32)
    z = jax.random.normal(ks[2], (N, C, H, W), jnp.float32)
    params = {
        # nn.Linear(3C, 3C*C): weight (out, in) = (L, 3C), bias (L,)
        "fc_w": jax.random.normal(ks[3], (L, C3), jnp.float32) / jnp.sqrt(C3),
        "fc_b": 0.1 * jax.random.normal(ks[4], (L,), jnp.float32),
        # nn.Conv1d(1, 1, 3, padding=1): weight (1, 1, 3), bias (1,)
        "conv_w": 0.5 * jax.random.normal(ks[5], (1, 1, 3), jnp.float32),
        "conv_b": 0.1 * jax.random.normal(ks[6], (1,), jnp.float32),
    }

    # f32 path: must match the f32 reference tightly.
    out = jax.block_until_ready(ccam_forward(x, y, z, params))
    ref = ccam_reference(x, y, z, params)
    assert out.shape == (N, C, H, W)
    assert jnp.allclose(out, ref, atol=1e-3, rtol=1e-3), float(
        jnp.max(jnp.abs(out - ref)))

    # bf16 streaming path (half the HBM bytes for the feature maps); looser
    # tolerance only because of bf16 rounding of p and of the stored output.
    xb, yb, zb = (v.astype(jnp.bfloat16) for v in (x, y, z))
    out_bf = jax.block_until_ready(ccam_forward(xb, yb, zb, params))
    ref_bf = ccam_reference(xb.astype(jnp.float32), yb.astype(jnp.float32),
                            zb.astype(jnp.float32), params)
    assert out_bf.dtype == jnp.bfloat16
    assert jnp.allclose(out_bf.astype(jnp.float32), ref_bf,
                        atol=3e-2, rtol=3e-2), float(
        jnp.max(jnp.abs(out_bf.astype(jnp.float32) - ref_bf)))

    print("KERNEL_OK")
</pallas_src>

<mosaic_0001>
module attributes {stable_mosaic.version = 11 : i64} {
  func.func @_ccam_kernel(%arg0: i32, %arg1: memref<2x4x256xf32, #tpu.memory_space<vmem>>, %arg2: memref<2x4x256xf32, #tpu.memory_space<vmem>>, %arg3: memref<2x4x256xf32, #tpu.memory_space<vmem>>, %arg4: memref<4x48xf32, #tpu.memory_space<vmem>>, %arg5: memref<4x48xf32, #tpu.memory_space<vmem>>, %arg6: memref<4x48xf32, #tpu.memory_space<vmem>>, %arg7: memref<1x48xf32, #tpu.memory_space<vmem>>, %arg8: memref<2x4x256xf32, #tpu.memory_space<vmem>>) attributes {dimension_semantics = [#tpu.dimension_semantics<parallel>], iteration_bounds = array<i64: 1>, scalar_prefetch = 0 : i64, scratch_operands = 0 : i64, tpu.core_type = #tpu.core_type<tc>, window_params = [{transform_indices = @transform_0, window_bounds = array<i64: 2, 4, 256>}, {transform_indices = @transform_1, window_bounds = array<i64: 2, 4, 256>}, {transform_indices = @transform_2, window_bounds = array<i64: 2, 4, 256>}, {pipeline_mode = #tpu.pipeline_mode<synchronous>, transform_indices = @transform_3, window_bounds = array<i64: 4, 48>}, {pipeline_mode = #tpu.pipeline_mode<synchronous>, transform_indices = @transform_4, window_bounds = array<i64: 4, 48>}, {pipeline_mode = #tpu.pipeline_mode<synchronous>, transform_indices = @transform_5, window_bounds = array<i64: 4, 48>}, {pipeline_mode = #tpu.pipeline_mode<synchronous>, transform_indices = @transform_6, window_bounds = array<i64: 1, 48>}, {transform_indices = @transform_7, window_bounds = array<i64: 2, 4, 256>}]} {
    %c0 = arith.constant 0 : index
    %c0_0 = arith.constant 0 : index
    %c0_1 = arith.constant 0 : index
    %0 = vector.load %arg1[%c0, %c0_0, %c0_1] : memref<2x4x256xf32, #tpu.memory_space<vmem>>, vector<2x4x256xf32>
    %cst = arith.constant dense<0.000000e+00> : vector<2x4xf32>
    %1 = vector.multi_reduction <add>, %0, %cst [2] : vector<2x4x256xf32> to vector<2x4xf32>
    %cst_2 = arith.constant 3.906250e-03 : f32
    %2 = vector.broadcast %cst_2 : f32 to vector<2x4xf32>
    %3 = arith.mulf %1, %2 : vector<2x4xf32>
    %c0_3 = arith.constant 0 : index
    %c0_4 = arith.constant 0 : index
    %c0_5 = arith.constant 0 : index
    %4 = vector.load %arg2[%c0_3, %c0_4, %c0_5] : memref<2x4x256xf32, #tpu.memory_space<vmem>>, vector<2x4x256xf32>
    %cst_6 = arith.constant dense<0.000000e+00> : vector<2x4xf32>
    %5 = vector.multi_reduction <add>, %4, %cst_6 [2] : vector<2x4x256xf32> to vector<2x4xf32>
    %cst_7 = arith.constant 3.906250e-03 : f32
    %6 = vector.broadcast %cst_7 : f32 to vector<2x4xf32>
    %7 = arith.mulf %5, %6 : vector<2x4xf32>
    %c0_8 = arith.constant 0 : index
    %c0_9 = arith.constant 0 : index
    %c0_10 = arith.constant 0 : index
    %8 = vector.load %arg3[%c0_8, %c0_9, %c0_10] : memref<2x4x256xf32, #tpu.memory_space<vmem>>, vector<2x4x256xf32>
    %cst_11 = arith.constant dense<0.000000e+00> : vector<2x4xf32>
    %9 = vector.multi_reduction <add>, %8, %cst_11 [2] : vector<2x4x256xf32> to vector<2x4xf32>
    %cst_12 = arith.constant 3.906250e-03 : f32
    %10 = vector.broadcast %cst_12 : f32 to vector<2x4xf32>
    %11 = arith.mulf %9, %10 : vector<2x4xf32>
    %c0_13 = arith.constant 0 : index
    %c0_14 = arith.constant 0 : index
    %12 = vector.load %arg4[%c0_13, %c0_14] : memref<4x48xf32, #tpu.memory_space<vmem>>, vector<4x48xf32>
    %cst_15 = arith.constant dense<0.000000e+00> : vector<2x48xf32>
    %13 = tpu.matmul %3, %12, %cst_15 {dimension_numbers = #tpu.dot_dimension_numbers<[1], [0], [0], [1], [0, 0, 1, 1], [], []>, precision = #tpu.contract_precision<fp32>} : vector<2x4xf32>, vector<4x48xf32>, vector<2x48xf32> -> vector<2x48xf32>
    %c0_16 = arith.constant 0 : index
    %c0_17 = arith.constant 0 : index
    %14 = vector.load %arg5[%c0_16, %c0_17] : memref<4x48xf32, #tpu.memory_space<vmem>>, vector<4x48xf32>
    %cst_18 = arith.constant dense<0.000000e+00> : vector<2x48xf32>
    %15 = tpu.matmul %7, %14, %cst_18 {dimension_numbers = #tpu.dot_dimension_numbers<[1], [0], [0], [1], [0, 0, 1, 1], [], []>, precision = #tpu.contract_precision<fp32>} : vector<2x4xf32>, vector<4x48xf32>, vector<2x48xf32> -> vector<2x48xf32>
    %16 = arith.addf %13, %15 : vector<2x48xf32>
    %c0_19 = arith.constant 0 : index
    %c0_20 = arith.constant 0 : index
    %17 = vector.load %arg6[%c0_19, %c0_20] : memref<4x48xf32, #tpu.memory_space<vmem>>, vector<4x48xf32>
    %cst_21 = arith.constant dense<0.000000e+00> : vector<2x48xf32>
    %18 = tpu.matmul %11, %17, %cst_21 {dimension_numbers = #tpu.dot_dimension_numbers<[1], [0], [0], [1], [0, 0, 1, 1], [], []>, precision = #tpu.contract_precision<fp32>} : vector<2x4xf32>, vector<4x48xf32>, vector<2x48xf32> -> vector<2x48xf32>
    %19 = arith.addf %16, %18 : vector<2x48xf32>
    %c0_22 = arith.constant 0 : index
    %c0_23 = arith.constant 0 : index
    %20 = vector.load %arg7[%c0_22, %c0_23] : memref<1x48xf32, #tpu.memory_space<vmem>>, vector<1x48xf32>
    %21 = vector.broadcast %20 : vector<1x48xf32> to vector<2x48xf32>
    %22 = arith.addf %19, %21 : vector<2x48xf32>
    %23 = vector.shape_cast %22 : vector<2x48xf32> to vector<2x4x12xf32>
    %cst_24 = arith.constant dense<0xFF800000> : vector<2x4xf32>
    %24 = vector.multi_reduction <maximumf>, %23, %cst_24 [2] : vector<2x4x12xf32> to vector<2x4xf32>
    %25 = vector.shape_cast %24 : vector<2x4xf32> to vector<2x4x1xf32>
    %26 = vector.broadcast %25 : vector<2x4x1xf32> to vector<2x4x12xf32>
    %27 = arith.subf %23, %26 : vector<2x4x12xf32>
    %28 = math.exp %27 : vector<2x4x12xf32>
    %cst_25 = arith.constant dense<0.000000e+00> : vector<2x4xf32>
    %29 = vector.multi_reduction <add>, %28, %cst_25 [2] : vector<2x4x12xf32> to vector<2x4xf32>
    %30 = vector.shape_cast %29 : vector<2x4xf32> to vector<2x4x1xf32>
    %31 = vector.broadcast %30 : vector<2x4x1xf32> to vector<2x4x12xf32>
    %32 = arith.divf %28, %31 : vector<2x4x12xf32>
    %33 = vector.extract_strided_slice %32 {offsets = [0, 0, 0], sizes = [2, 4, 4], strides = [1, 1, 1]} : vector<2x4x12xf32> to vector<2x4x4xf32>
    %34 = vector.extract_strided_slice %32 {offsets = [0, 0, 4], sizes = [2, 4, 4], strides = [1, 1, 1]} : vector<2x4x12xf32> to vector<2x4x4xf32>
    %35 = vector.extract_strided_slice %32 {offsets = [0, 0, 8], sizes = [2, 4, 4], strides = [1, 1, 1]} : vector<2x4x12xf32> to vector<2x4x4xf32>
    %36 = vector.extract_strided_slice %33 {offsets = [0, 0, 0], sizes = [1, 4, 4], strides = [1, 1, 1]} : vector<2x4x4xf32> to vector<1x4x4xf32>
    %37 = vector.shape_cast %36 : vector<1x4x4xf32> to vector<4x4xf32>
    %c0_26 = arith.constant 0 : index
    %c0_27 = arith.constant 0 : index
    %c0_28 = arith.constant 0 : index
    %38 = vector.load %arg1[%c0_26, %c0_27, %c0_28] : memref<2x4x256xf32, #tpu.memory_space<vmem>>, vector<1x4x256xf32>
    %39 = vector.shape_cast %38 : vector<1x4x256xf32> to vector<4x256xf32>
    %cst_29 = arith.constant dense<0.000000e+00> : vector<4x256xf32>
    %40 = tpu.matmul %37, %39, %cst_29 {dimension_numbers = #tpu.dot_dimension_numbers<[1], [0], [0], [1], [0, 0, 1, 1], [], []>, precision = #tpu.contract_precision<fp32>} : vector<4x4xf32>, vector<4x256xf32>, vector<4x256xf32> -> vector<4x256xf32>
    %41 = vector.extract_strided_slice %34 {offsets = [0, 0, 0], sizes = [1, 4, 4], strides = [1, 1, 1]} : vector<2x4x4xf32> to vector<1x4x4xf32>
    %42 = vector.shape_cast %41 : vector<1x4x4xf32> to vector<4x4xf32>
    %c0_30 = arith.constant 0 : index
    %c0_31 = arith.constant 0 : index
    %c0_32 = arith.constant 0 : index
    %43 = vector.load %arg2[%c0_30, %c0_31, %c0_32] : memref<2x4x256xf32, #tpu.memory_space<vmem>>, vector<1x4x256xf32>
    %44 = vector.shape_cast %43 : vector<1x4x256xf32> to vector<4x256xf32>
    %cst_33 = arith.constant dense<0.000000e+00> : vector<4x256xf32>
    %45 = tpu.matmul %42, %44, %cst_33 {dimension_numbers = #tpu.dot_dimension_numbers<[1], [0], [0], [1], [0, 0, 1, 1], [], []>, precision = #tpu.contract_precision<fp32>} : vector<4x4xf32>, vector<4x256xf32>, vector<4x256xf32> -> vector<4x256xf32>
    %46 = arith.addf %40, %45 : vector<4x256xf32>
    %47 = vector.extract_strided_slice %35 {offsets = [0, 0, 0], sizes = [1, 4, 4], strides = [1, 1, 1]} : vector<2x4x4xf32> to vector<1x4x4xf32>
    %48 = vector.shape_cast %47 : vector<1x4x4xf32> to vector<4x4xf32>
    %c0_34 = arith.constant 0 : index
    %c0_35 = arith.constant 0 : index
    %c0_36 = arith.constant 0 : index
    %49 = vector.load %arg3[%c0_34, %c0_35, %c0_36] : memref<2x4x256xf32, #tpu.memory_space<vmem>>, vector<1x4x256xf32>
    %50 = vector.shape_cast %49 : vector<1x4x256xf32> to vector<4x256xf32>
    %cst_37 = arith.constant dense<0.000000e+00> : vector<4x256xf32>
    %51 = tpu.matmul %48, %50, %cst_37 {dimension_numbers = #tpu.dot_dimension_numbers<[1], [0], [0], [1], [0, 0, 1, 1], [], []>, precision = #tpu.contract_precision<fp32>} : vector<4x4xf32>, vector<4x256xf32>, vector<4x256xf32> -> vector<4x256xf32>
    %52 = arith.addf %46, %51 : vector<4x256xf32>
    %c0_38 = arith.constant 0 : index
    %c0_39 = arith.constant 0 : index
    %c0_40 = arith.constant 0 : index
    %53 = vector.load %arg8[%c0_38, %c0_39, %c0_40] : memref<2x4x256xf32, #tpu.memory_space<vmem>>, vector<1x4x256xf32>
    %54 = vector.shape_cast %53 : vector<1x4x256xf32> to vector<4x256xf32>
    %55 = vector.shape_cast %52 : vector<4x256xf32> to vector<1x4x256xf32>
    tpu.vector_store %arg8[%c0_38, %c0_39, %c0_40], %55 {strides = array<i32>} : memref<2x4x256xf32, #tpu.memory_space<vmem>>, vector<1x4x256xf32>,
    %56 = vector.extract_strided_slice %33 {offsets = [1, 0, 0], sizes = [1, 4, 4], strides = [1, 1, 1]} : vector<2x4x4xf32> to vector<1x4x4xf32>
    %57 = vector.shape_cast %56 : vector<1x4x4xf32> to vector<4x4xf32>
    %c1 = arith.constant 1 : index
    %c0_41 = arith.constant 0 : index
    %c0_42 = arith.constant 0 : index
    %58 = vector.load %arg1[%c1, %c0_41, %c0_42] : memref<2x4x256xf32, #tpu.memory_space<vmem>>, vector<1x4x256xf32>
    %59 = vector.shape_cast %58 : vector<1x4x256xf32> to vector<4x256xf32>
    %cst_43 = arith.constant dense<0.000000e+00> : vector<4x256xf32>
    %60 = tpu.matmul %57, %59, %cst_43 {dimension_numbers = #tpu.dot_dimension_numbers<[1], [0], [0], [1], [0, 0, 1, 1], [], []>, precision = #tpu.contract_precision<fp32>} : vector<4x4xf32>, vector<4x256xf32>, vector<4x256xf32> -> vector<4x256xf32>
    %61 = vector.extract_strided_slice %34 {offsets = [1, 0, 0], sizes = [1, 4, 4], strides = [1, 1, 1]} : vector<2x4x4xf32> to vector<1x4x4xf32>
    %62 = vector.shape_cast %61 : vector<1x4x4xf32> to vector<4x4xf32>
    %c1_44 = arith.constant 1 : index
    %c0_45 = arith.constant 0 : index
    %c0_46 = arith.constant 0 : index
    %63 = vector.load %arg2[%c1_44, %c0_45, %c0_46] : memref<2x4x256xf32, #tpu.memory_space<vmem>>, vector<1x4x256xf32>
    %64 = vector.shape_cast %63 : vector<1x4x256xf32> to vector<4x256xf32>
    %cst_47 = arith.constant dense<0.000000e+00> : vector<4x256xf32>
    %65 = tpu.matmul %62, %64, %cst_47 {dimension_numbers = #tpu.dot_dimension_numbers<[1], [0], [0], [1], [0, 0, 1, 1], [], []>, precision = #tpu.contract_precision<fp32>} : vector<4x4xf32>, vector<4x256xf32>, vector<4x256xf32> -> vector<4x256xf32>
    %66 = arith.addf %60, %65 : vector<4x256xf32>
    %67 = vector.extract_strided_slice %35 {offsets = [1, 0, 0], sizes = [1, 4, 4], strides = [1, 1, 1]} : vector<2x4x4xf32> to vector<1x4x4xf32>
    %68 = vector.shape_cast %67 : vector<1x4x4xf32> to vector<4x4xf32>
    %c1_48 = arith.constant 1 : index
    %c0_49 = arith.constant 0 : index
    %c0_50 = arith.constant 0 : index
    %69 = vector.load %arg3[%c1_48, %c0_49, %c0_50] : memref<2x4x256xf32, #tpu.memory_space<vmem>>, vector<1x4x256xf32>
    %70 = vector.shape_cast %69 : vector<1x4x256xf32> to vector<4x256xf32>
    %cst_51 = arith.constant dense<0.000000e+00> : vector<4x256xf32>
    %71 = tpu.matmul %68, %70, %cst_51 {dimension_numbers = #tpu.dot_dimension_numbers<[1], [0], [0], [1], [0, 0, 1, 1], [], []>, precision = #tpu.contract_precision<fp32>} : vector<4x4xf32>, vector<4x256xf32>, vector<4x256xf32> -> vector<4x256xf32>
    %72 = arith.addf %66, %71 : vector<4x256xf32>
    %c1_52 = arith.constant 1 : index
    %c0_53 = arith.constant 0 : index
    %c0_54 = arith.constant 0 : index
    %73 = vector.load %arg8[%c1_52, %c0_53, %c0_54] : memref<2x4x256xf32, #tpu.memory_space<vmem>>, vector<1x4x256xf32>
    %74 = vector.shape_cast %73 : vector<1x4x256xf32> to vector<4x256xf32>
    %75 = vector.shape_cast %72 : vector<4x256xf32> to vector<1x4x256xf32>
    tpu.vector_store %arg8[%c1_52, %c0_53, %c0_54], %75 {strides = array<i32>} : memref<2x4x256xf32, #tpu.memory_space<vmem>>, vector<1x4x256xf32>,
    return
  }
  func.func @transform_0(%arg0: i32) -> (i32, i32, i32) {
    %c0_i32 = arith.constant 0 : i32
    %c0_i32_0 = arith.constant 0 : i32
    %c0_i32_1 = arith.constant 0 : i32
    return %arg0, %c0_i32, %c0_i32_0 : i32, i32, i32
  }
  func.func @transform_1(%arg0: i32) -> (i32, i32, i32) {
    %c0_i32 = arith.constant 0 : i32
    %c0_i32_0 = arith.constant 0 : i32
    %c0_i32_1 = arith.constant 0 : i32
    return %arg0, %c0_i32, %c0_i32_0 : i32, i32, i32
  }
  func.func @transform_2(%arg0: i32) -> (i32, i32, i32) {
    %c0_i32 = arith.constant 0 : i32
    %c0_i32_0 = arith.constant 0 : i32
    %c0_i32_1 = arith.constant 0 : i32
    return %arg0, %c0_i32, %c0_i32_0 : i32, i32, i32
  }
  func.func @transform_3(%arg0: i32) -> (i32, i32) {
    %c0_i32 = arith.constant 0 : i32
    %c0_i32_0 = arith.constant 0 : i32
    %c0_i32_1 = arith.constant 0 : i32
    return %c0_i32, %c0_i32_0 : i32, i32
  }
  func.func @transform_4(%arg0: i32) -> (i32, i32) {
    %c0_i32 = arith.constant 0 : i32
    %c0_i32_0 = arith.constant 0 : i32
    %c0_i32_1 = arith.constant 0 : i32
    return %c0_i32, %c0_i32_0 : i32, i32
  }
  func.func @transform_5(%arg0: i32) -> (i32, i32) {
    %c0_i32 = arith.constant 0 : i32
    %c0_i32_0 = arith.constant 0 : i32
    %c0_i32_1 = arith.constant 0 : i32
    return %c0_i32, %c0_i32_0 : i32, i32
  }
  func.func @transform_6(%arg0: i32) -> (i32, i32) {
    %c0_i32 = arith.constant 0 : i32
    %c0_i32_0 = arith.constant 0 : i32
    %c0_i32_1 = arith.constant 0 : i32
    return %c0_i32, %c0_i32_0 : i32, i32
  }
  func.func @transform_7(%arg0: i32) -> (i32, i32, i32) {
    %c0_i32 = arith.constant 0 : i32
    %c0_i32_0 = arith.constant 0 : i32
    %c0_i32_1 = arith.constant 0 : i32
    return %arg0, %c0_i32, %c0_i32_0 : i32, i32, i32
  }
}

</mosaic_0001>

<bundles_post_ra>
// kernel: tpu_custom_call.1
= control target key start
LH: loop header
LB: loop body
LE: loop exit
PB: predicated region body
PF: predicated region fallthrough
CT: control target
= control target key end

     0   :  { %12 = vsyncpa [#allocation3], 0  ;;  %s2959_s0 = inlined_call_operand.hbm [shape: f32[2,4,256], index: 0, kind: input, shape index: {}]   ;;  %s2960_s1 = inlined_call_operand.hbm [shape: f32[2,4,256], index: 1, kind: input, shape index: {}]   ;;  %s2961_s2 = inlined_call_operand.hbm [shape: f32[2,4,256], index: 2, kind: input, shape index: {}]   ;;  %s2962_s3 = inlined_call_operand.hbm [shape: f32[4,48], index: 3, kind: input, shape index: {}]   ;;  %s2963_s4 = inlined_call_operand.hbm [shape: f32[4,48], index: 4, kind: input, shape index: {}]   ;;  %s2964_s5 = inlined_call_operand.vmem [shape: f32[4,48], index: 5, kind: input, shape index: {}]   ;;  %s2965_s6 = inlined_call_operand.vmem [shape: f32[1,48], index: 6, kind: input, shape index: {}]   ;;  %s2966_s7 = inlined_call_operand.hbm [shape: f32[2,4,256], index: 7, kind: output, shape index: {}]  }
   0x1   :  { %13 = vsyncpa [#allocation6], 0 }
   0x2   :  { %14 = vsyncpa [#allocation9], 0 }
   0x3   :  { %15 = vsyncpa [#allocation4], 0  ;;  %s33_s26 = sshll.u32 %s2960_s1, 4  ;;  %s2789_s27 = smov [#allocation5]   ;;  %s34_s26 = int_to_ptr.hbm [resolvable:$true] %s33_s26 }
   0x4   :  { %s35_s28 = sshll.u32 %s2789_s27, 4  ;;  %s60_s8 = sshll.u32 %s2962_s3, 4  ;;  %s36_s28 = int_to_ptr.vmem [resolvable:$true] %s35_s28  ;;  %s61_s8 = int_to_ptr.hbm [resolvable:$true] %s60_s8 }
   0x5   :  { %s2790_s9 = smov 128   ;;  %s2791_s10 = smov 8  }
   0x6   :  { %41 = dma.hbm_to_vmem [thread:$0]  %s34_s26, 256, %s36_s28, [#allocation6], %s2790_s9, %s2790_s9, %s2791_s10  }
   0x7   :  { %s2792_s11 = smov [#allocation8]   ;;  %s20_s1 = sshll.u32 %s2959_s0, 4  ;;  %s21_s1 = int_to_ptr.hbm [resolvable:$true] %s20_s1 }
   0x8   :  { %s62_s12 = sshll.u32 %s2792_s11, 4  ;;  %s46_s3 = sshll.u32 %s2961_s2, 4  ;;  %s63_s12 = int_to_ptr.vmem [resolvable:$true] %s62_s12  ;;  %s47_s3 = int_to_ptr.hbm [resolvable:$true] %s46_s3 }
   0x9   :  { %65 = dma.hbm_to_vmem [thread:$0]  %s61_s8, 64, %s63_s12, [#allocation9]  }
   0xa   :  { %s2793_s17 = smov [#allocation2]   ;;  %s2794_s19 = smov [#allocation7]  }
   0xb   :  { %s22_s18 = sshll.u32 %s2793_s17, 4  ;;  %s48_s20 = sshll.u32 %s2794_s19, 4  ;;  %s23_s18 = int_to_ptr.vmem [resolvable:$true] %s22_s18  ;;  %s49_s20 = int_to_ptr.vmem [resolvable:$true] %s48_s20 }
   0xc   :  { %28 = dma.hbm_to_vmem [thread:$0]  %s21_s1, 256, %s23_s18, [#allocation3], %s2790_s9, %s2790_s9, %s2791_s10  }
   0xd   :  { %s71_s0 = sshll.u32 %s2963_s4, 4  ;;  %s2795_s2 = smov [#allocation10]   ;;  %s72_s0 = int_to_ptr.hbm [resolvable:$true] %s71_s0 }
   0xe   :  { %54 = dma.hbm_to_vmem [thread:$0]  %s47_s3, 256, %s49_s20, [#allocation6], %s2790_s9, %s2790_s9, %s2791_s10  }
   0xf   :  { %s73_s23 = sshll.u32 %s2795_s2, 4  ;;  %s74_s23 = int_to_ptr.vmem [resolvable:$true] %s73_s23 }
  0x10   :  { %76 = dma.hbm_to_vmem [thread:$0]  %s72_s0, 64, %s74_s23, [#allocation9]  }
  0x11   :  { %2781 = dma.done.wait [#allocation3], 256  }
  0x12   :  { %2782 = vsyncadd [#allocation3], 4294967040 }
  0x13   :  { %2783 = dma.done.wait [#allocation6], 512  }
  0x14   :  { %2784 = vsyncadd [#allocation6], 4294966784 }
  0x15   :  { %2785 = dma.done.wait [#allocation9], 128  }
  0x16   :  { %2786 = vsyncadd [#allocation9], 4294967168  ;;  %v2868_v0 = vld [vmem:[#allocation2] sm:$0xff]  ;;  %v2871_v1 = vld [vmem:[#allocation2 + $0x8] sm:$0xff]  ;;  %vm116_vm0 = vcmask 1043456   ;;  %v187_v51 = vlaneseq  ;;  %vm191_vm1 = vcmask 1041409  }
  0x17   :  { %105 = vst [vmem:[#allocation1] ss:$2 sm:$0xff] %v2868_v0  ;;  %v129_v2 = vld [vmem:[#allocation5] sm:$0xff]  ;;  %v2874_v3 = vld [vmem:[#allocation5 + $0x8] sm:$0xff]  ;;  %v2881_v13 = vld [vmem:[#allocation7] sm:$0xff]  ;;  %vm193_vm2 = vcmask 31744  }
  0x18   :  { %109 = vst [vmem:[#allocation1 + $0x10] ss:$2 sm:$0xff] %v2871_v1  ;;  %v2883_v14 = vld [vmem:[#allocation7 + $0x8] sm:$0xff]  ;;  %v184_v36 = vld [vmem:[#allocation10] sm:$0xf]  ;;  %v188_v53 = vand.u32 127, %v187_v51 }
  0x19   :  { %v197_v37 = vsel %vm116_vm0, %v184_v36, 0  ;;  %v183_v43 = vld [vmem:[#allocation8] sm:$0xf]  ;;  %v501_v56 = vld [vmem:[%s2964_s5] sm:$0xf]  ;;  %s2796_s26 = smov 104  }
  0x1a   :  { %v214_v38 = vand.u32 4294901760, %v197_v37  ;;  %v353_v44 = vsel %vm116_vm0, %v183_v43, 0  ;;  %v510_v60 = vsel %vm116_vm0, %v501_v56, 0  ;;  %s2797_s27 = smov 116   ;;  %s2798_s28 = smov 92   ;;  %vm675_vm3 = vcmask 1047556  }
  0x1b   :  { %v370_v45 = vand.u32 4294901760, %v353_v44  ;;  %v527_v63 = vand.u32 4294901760, %v510_v60  ;;  %vm695_vm4 = vcmask 93184   ;;  %s2802_s29 = smov 120   ;;  %s2803_s30 = smov [#allocation11]  }
  0x1c   :  { %v241_v39 = vsub.f32 %v197_v37, %v214_v38  ;;  %291 = vmatpush.msra.mxu3 %v214_v38  ;;  %215 = vmatpush.msra.mxu0 %v214_v38  ;;  %s2596_s8 = sshll.u32 %s2803_s30, 4  ;;  %s2598_s13 = sshll.u32 %s2966_s7, 4  ;;  %s2597_s8 = int_to_ptr.vmem [resolvable:$true] %s2596_s8  ;;  %s2599_s13 = int_to_ptr.hbm [resolvable:$true] %s2598_s13 }
  0x1d   :  { %v397_v46 = vsub.f32 %v353_v44, %v370_v45 }
  0x1e   :  { %v106_v4 = vld.sshfl [vmem:[#allocation1] sm:$0xff pattern:$0x75316420]  ;;  %v107_v5 = vld.sshfl [vmem:[#allocation1 + $0x8] sm:$0xff pattern:$0x75316420]  ;;  %268 = vmatpush.msra.mxu2 %v241_v39 }
  0x1f   :  { %v117_v6 = vsel %vm116_vm0, %v106_v4, 0.0  ;;  %v118_v7 = vsel %vm116_vm0, %v107_v5, 0.0  ;;  %133 = vst [vmem:[#allocation1] ss:$2 sm:$0xff] %v129_v2  ;;  %v242_v40 = vand.u32 4294901760, %v241_v39  ;;  %v398_v47 = vand.u32 4294901760, %v397_v46 }
  0x20   :  { %v119_v8 = vadd.f32 %v118_v7, %v117_v6  ;;  %v110_v9 = vld.sshfl [vmem:[#allocation1 + $0x10] sm:$0xff pattern:$0x75316420]  ;;  %v111_v10 = vld.sshfl [vmem:[#allocation1 + $0x18] sm:$0xff pattern:$0x75316420]  ;;  %371 = vmatpush.msrb.mxu2 %v370_v45 }
  0x21   :  { %137 = vst [vmem:[#allocation1 + $0x10] ss:$2 sm:$0xff] %v2874_v3  ;;  %v122_v11 = vsel %vm116_vm0, %v110_v9, 0.0  ;;  %v123_v12 = vsel %vm116_vm0, %v111_v10, 0.0  ;;  %v243_v41 = vsub.f32 %v241_v39, %v242_v40  ;;  %317 = vmatpush.msrb.mxu0 %v242_v40  ;;  %v399_v49 = vsub.f32 %v397_v46, %v398_v47 }
  0x22   :  { %120 = vadd.xlane.f32.xlu1 %v119_v8  ;;  %v124_v17 = vadd.f32 %v123_v12, %v122_v11  ;;  %v554_v8 = vsub.f32 %v510_v60, %v527_v63 }
  0x23   :  { %v244_v42 = vand.u32 4294901760, %v243_v41  ;;  %v400_v50 = vand.u32 4294901760, %v399_v49 }
  0x25   :  { %245 = vmatpush.msra.mxu1 %v244_v42  ;;  %401 = vmatpush.msrb.mxu3 %v400_v50 }
  0x26   :  { %v134_v15 = vld.sshfl [vmem:[#allocation1] sm:$0xff pattern:$0x75316420]  ;;  %v135_v16 = vld.sshfl [vmem:[#allocation1 + $0x8] sm:$0xff pattern:$0x75316420] }
  0x27   :  { %v144_v18 = vsel %vm116_vm0, %v134_v15, 0.0  ;;  %v145_v19 = vsel %vm116_vm0, %v135_v16, 0.0  ;;  %160 = vst [vmem:[#allocation1] ss:$2 sm:$0xff] %v2881_v13  ;;  %339 = vmatpush.msrb.mxu1 %v214_v38  ;;  %v555_v16 = vand.u32 4294901760, %v554_v8 }
  0x28   :  { %v146_v20 = vadd.f32 %v145_v19, %v144_v18  ;;  %v138_v21 = vld.sshfl [vmem:[#allocation1 + $0x10] sm:$0xff pattern:$0x75316420]  ;;  %v139_v22 = vld.sshfl [vmem:[#allocation1 + $0x18] sm:$0xff pattern:$0x75316420] }
  0x29   :  { %164 = vst [vmem:[#allocation1 + $0x10] ss:$2 sm:$0xff] %v2883_v14  ;;  %v149_v23 = vsel %vm116_vm0, %v138_v21, 0.0  ;;  %v150_v24 = vsel %vm116_vm0, %v139_v22, 0.0 }
  0x2a   :  { %147 = vadd.xlane.f32.xlu0 %v146_v20  ;;  %125 = vadd.xlane.f32.xlu1 %v124_v17  ;;  %v151_v25 = vadd.f32 %v150_v24, %v149_v23  ;;  %v556_v23 = vsub.f32 %v554_v8, %v555_v16 }
  0x2e   :  { %v161_v26 = vld.sshfl [vmem:[#allocation1] sm:$0xff pattern:$0x75316420]  ;;  %v162_v27 = vld.sshfl [vmem:[#allocation1 + $0x8] sm:$0xff pattern:$0x75316420] }
  0x2f   :  { %v171_v28 = vsel %vm116_vm0, %v161_v26, 0.0  ;;  %v172_v29 = vsel %vm116_vm0, %v162_v27, 0.0  ;;  %750 = vst [vmem:[#allocation1] ss:$2 sm:$0xff] %v129_v2 }
  0x30   :  { %v173_v30 = vadd.f32 %v172_v29, %v171_v28  ;;  %v165_v31 = vld.sshfl [vmem:[#allocation1 + $0x10] sm:$0xff pattern:$0x75316420]  ;;  %v166_v32 = vld.sshfl [vmem:[#allocation1 + $0x18] sm:$0xff pattern:$0x75316420] }
  0x31   :  { %v176_v33 = vsel %vm116_vm0, %v165_v31, 0.0  ;;  %v177_v34 = vsel %vm116_vm0, %v166_v32, 0.0  ;;  %v557_v29 = vand.u32 4294901760, %v556_v23  ;;  %v2800_v23 = vmov 1934713408  }
  0x32   :  { %152 = vadd.xlane.f32.xlu0 %v151_v25  ;;  %174 = vadd.xlane.f32.xlu2 %v173_v30  ;;  %v178_v35 = vadd.f32 %v177_v34, %v176_v33 }
  0x3a   :  { %179 = vadd.xlane.f32.xlu2 %v178_v35 }
  0x95   :  { %v121_v48 = vpop.xlane.xlu1 %120 }
  0x96   :  { %v127_v52 = vmul.f32 0.00390625, %v121_v48 }
  0x98   :  { %v347_v57 = vperm.slane %v127_v52, %v188_v53 }
  0x9d   :  { %v148_v54 = vpop.xlane.xlu0 %147  ;;  %v126_v55 = vpop.xlane.xlu1 %125 }
  0x9e   :  { %v128_v58 = vmul.f32 0.00390625, %v126_v55  ;;  %v154_v2 = vmul.f32 0.00390625, %v148_v54 }
  0xa0   :  { %v348_v59 = vperm.slane %v128_v58, %v188_v53  ;;  %v189_v9 = vperm.slane %v154_v2, %v188_v53 }
  0xa2   :  { %v349_v61 = vsel %vm191_vm1, %v348_v59, %v347_v57 }
  0xa3   :  { %v350_v62 = vsel %vm193_vm2, %v349_v61, 0 }
  0xa4   :  { %v372_v6 = vand.u32 4294901760, %v350_v62 }
  0xa5   :  { %v153_v4 = vpop.xlane.xlu0 %152  ;;  %v175_v5 = vpop.xlane.xlu2 %174 }
  0xa6   :  { %v155_v7 = vmul.f32 0.00390625, %v153_v4  ;;  %v373_v12 = vsub.f32 %v350_v62, %v372_v6  ;;  %v181_v19 = vmul.f32 0.00390625, %v175_v5 }
  0xa8   :  { %v190_v10 = vperm.slane %v155_v7, %v188_v53  ;;  %v374_v22 = vand.u32 4294901760, %v373_v12  ;;  %v504_v25 = vperm.slane %v181_v19, %v188_v53 }
  0xaa   :  { %v192_v11 = vsel %vm191_vm1, %v190_v10, %v189_v9  ;;  %v375_v28 = vsub.f32 %v373_v12, %v374_v22 }
  0xab   :  { %v194_v15 = vsel %vm193_vm2, %v192_v11, 0 }
  0xac   :  { %v216_v17 = vand.u32 4294901760, %v194_v15  ;;  %v376_v32 = vand.u32 4294901760, %v375_v28 }
  0xad   :  { %v180_v18 = vpop.xlane.xlu2 %179 }
  0xae   :  { %247 = vmatmul.f32.vlgmr.msra.gmra.mxu1 %v216_v17  ;;  %v217_v20 = vsub.f32 %v194_v15, %v216_v17  ;;  %v182_v21 = vmul.f32 0.00390625, %v180_v18  ;;  %v2799_v18 = vmov 1983009808  }
  0xaf   :  { %447 = vmatpush.msra.mxu1 %v370_v45  ;;  %v678_v19 = vunpack.c.l.s4 %v2799_v18 }
  0xb0   :  { %271 = vmatmul.f32.vlgmr.msra.gmra.mxu2 %v217_v20  ;;  %v218_v24 = vand.u32 4294901760, %v217_v20  ;;  %v505_v26 = vperm.slane %v182_v21, %v188_v53 }
  0xb1   :  { %473 = vmatpush.msra.mxu2 %v398_v47 }
  0xb2   :  { %295 = vmatmul.f32.vlgmr.msra.gmra.mxu3 %v218_v24  ;;  %v219_v27 = vsub.f32 %v217_v20, %v218_v24  ;;  %v506_v31 = vsel %vm191_vm1, %v505_v26, %v504_v25  ;;  %v690_v24 = vunpack.c.l.s4 %v2800_v23  ;;  %v679_v25 = vunpack.c.0.s8 %v678_v19 }
  0xb3   :  { %495 = vmatpush.msra.mxu3 %v370_v45  ;;  %v507_v33 = vsel %vm193_vm2, %v506_v31, 0 }
  0xb4   :  { %v220_v30 = vand.u32 4294901760, %v219_v27  ;;  %v529_v34 = vand.u32 4294901760, %v507_v33 }
  0xb6   :  { %221 = vmatmul.f32.vlgmr.msra.gmra.mxu0 %v220_v30  ;;  %341 = vmatmul.f32.vlgmr.msrb.gmra.mxu1 %v216_v17  ;;  %v530_v35 = vsub.f32 %v507_v33, %v529_v34  ;;  %v691_v30 = vunpack.c.0.s8 %v690_v24 }
  0xb7   :  { %424 = vmatpush.msra.mxu0 %v397_v46  ;;  %558 = vmatpush.msrb.mxu1 %v557_v29 }
  0xb8   :  { %377 = vmatmul.f32.vlgmr.msrb.gmra.mxu2 %v376_v32  ;;  %v531_v36 = vand.u32 4294901760, %v530_v35 }
  0xb9   :  { %581 = vmatpush.msrb.mxu2 %v554_v8 }
  0xba   :  { %403 = vmatmul.f32.vlgmr.msrb.gmra.mxu3 %v372_v6  ;;  %v532_v37 = vsub.f32 %v530_v35, %v531_v36 }
  0xbb   :  { %604 = vmatpush.msrb.mxu3 %v527_v63 }
  0xbc   :  { %v533_v38 = vand.u32 4294901760, %v532_v37 }
  0xbe   :  { %319 = vmatmul.f32.vlgmr.msrb.gmra.mxu0 %v216_v17  ;;  %451 = vmatmul.f32.vlgmr.msra.gmra.mxu1 %v374_v22 }
  0xbf   :  { %528 = vmatpush.msrb.mxu0 %v527_v63  ;;  %652 = vmatpush.msra.mxu1 %v527_v63 }
  0xc0   :  { %475 = vmatmul.f32.vlgmr.msra.gmra.mxu2 %v372_v6 }
  0xc2   :  { %497 = vmatmul.f32.vlgmr.msra.gmra.mxu3 %v372_v6 }
  0xc6   :  { %427 = vmatmul.f32.vlgmr.msra.gmra.mxu0 %v373_v12  ;;  %560 = vmatmul.f32.vlgmr.msrb.gmra.mxu1 %v529_v34  ;;  %v2628_v12 = vld [vmem:[%s2965_s6] ss:$0 sm:$0xff]  ;;  %s2801_s6 = smov 124  }
  0xc7   :  { %630 = vmatpush.msra.mxu0 %v555_v16 }
  0xc8   :  { %584 = vmatmul.f32.vlgmr.msrb.gmra.mxu2 %v530_v35 }
  0xca   :  { %608 = vmatmul.f32.vlgmr.msrb.gmra.mxu3 %v531_v36 }
  0xce   :  { %534 = vmatmul.f32.vlgmr.msrb.gmra.mxu0 %v533_v38  ;;  %654 = vmatmul.f32.vlgmr.msra.gmra.mxu1 %v529_v34 }
  0xd6   :  { %632 = vmatmul.f32.vlgmr.msra.gmra.mxu0 %v529_v34 }
 0x12b   :  { %v248_v39 = vpop.f32.mrf.mxu1 }
 0x133   :  { %v222_v40 = vpop.f32.mrf.mxu0  ;;  %v272_v41 = vpop.f32.mrf.mxu2 }
 0x134   :  { %v249_v42 = vadd.f32 %v248_v39, %v222_v40  ;;  %v342_v45 = vpop.f32.mrf.mxu1 }
 0x135   :  { %v296_v43 = vpop.f32.mrf.mxu3 }
 0x136   :  { %v273_v44 = vadd.f32 %v272_v41, %v249_v42 }
 0x138   :  { %v297_v46 = vadd.f32 %v296_v43, %v273_v44 }
 0x13b   :  { %v320_v47 = vpop.f32.mrf.mxu0  ;;  %v378_v48 = vpop.f32.mrf.mxu2 }
 0x13c   :  { %v321_v49 = vadd.f32 %v320_v47, %v297_v46  ;;  %v452_v52 = vpop.f32.mrf.mxu1 }
 0x13d   :  { %v404_v50 = vpop.f32.mrf.mxu3 }
 0x13e   :  { %v343_v51 = vadd.f32 %v342_v45, %v321_v49 }
 0x140   :  { %v379_v53 = vadd.f32 %v378_v48, %v343_v51 }
 0x142   :  { %v405_v56 = vadd.f32 %v404_v50, %v379_v53 }
 0x143   :  { %v428_v54 = vpop.f32.mrf.mxu0  ;;  %v476_v55 = vpop.f32.mrf.mxu2 }
 0x144   :  { %v429_v58 = vadd.f32 %v428_v54, %v405_v56  ;;  %v561_v59 = vpop.f32.mrf.mxu1 }
 0x145   :  { %v498_v57 = vpop.f32.mrf.mxu3 }
 0x146   :  { %v453_v63 = vadd.f32 %v452_v52, %v429_v58 }
 0x148   :  { %v477_v5 = vadd.f32 %v476_v55, %v453_v63 }
 0x14a   :  { %v499_v10 = vadd.f32 %v498_v57, %v477_v5 }
 0x14b   :  { %v535_v60 = vpop.f32.mrf.mxu0  ;;  %v585_v62 = vpop.f32.mrf.mxu2 }
 0x14c   :  { %v562_v61 = vadd.f32 %v561_v59, %v535_v60  ;;  %v655_v9 = vpop.f32.mrf.mxu1 }
 0x14d   :  { %v609_v4 = vpop.f32.mrf.mxu3 }
 0x14e   :  { %v586_v2 = vadd.f32 %v585_v62, %v562_v61 }
 0x150   :  { %v610_v6 = vadd.f32 %v609_v4, %v586_v2 }
 0x153   :  { %v633_v7 = vpop.f32.mrf.mxu0 }
 0x154   :  { %v634_v8 = vadd.f32 %v633_v7, %v610_v6 }
 0x156   :  { %v656_v11 = vadd.f32 %v655_v9, %v634_v8 }
 0x158   :  { %v658_v15 = vadd.f32 %v656_v11, %v499_v10 }
 0x15a   :  { %v663_v16 = vadd.f32 %v2628_v12, %v658_v15  ;;  %v751_v12 = vld.sshfl [vmem:[#allocation1] sm:$0xff pattern:$0x75316420] }
 0x15b   :  { %v755_v15 = vsel %vm116_vm0, %v751_v12, 0 }
 0x15c   :  { %668 = vrot.lane.b32.xlu2 %v663_v16, %s2796_s26  ;;  %665 = vrot.lane.b32.xlu1 %v663_v16, %s2797_s27 }
 0x15d   :  { %671 = vrot.lane.b32.xlu0 %v663_v16, %s2798_s28 }
 0x1b6   :  { %v669_v17 = vpop.permute.xlu2 %668 }
 0x1b7   :  { %v674_v20 = vrot.slane %v669_v17, 4 }
 0x1b9   :  { %v676_v27 = vsel %vm675_vm3, %v674_v20, %v663_v16  ;;  %v774_v16 = vand.u32 4294901760, %v755_v15 }
 0x1ba   :  { %v680_v31 = vperm.slane %v676_v27, %v679_v25 }
 0x1bb   :  { %v801_v17 = vsub.f32 %v755_v15, %v774_v16  ;;  %775 = vmatpush.msra.mxu2 %v774_v16  ;;  %851 = vmatpush.msrb.mxu1 %v774_v16 }
 0x1bd   :  { %v802_v18 = vand.u32 4294901760, %v801_v17  ;;  %828 = vmatpush.msrb.mxu0 %v801_v17 }
 0x1bf   :  { %v803_v19 = vsub.f32 %v801_v17, %v802_v18  ;;  %877 = vmatpush.msrb.mxu2 %v802_v18 }
 0x1c1   :  { %v804_v20 = vand.u32 4294901760, %v803_v19 }
 0x1c3   :  { %805 = vmatpush.msra.mxu3 %v804_v20 }
 0x1c5   :  { %899 = vmatpush.msrb.mxu3 %v774_v16 }
 0x1ce   :  { %v666_v26 = vpop.permute.xlu1 %665 }
 0x1cf   :  { %v672_v21 = vpop.permute.xlu0 %671 }
 0x1d0   :  { %v681_v22 = vrot.slane %v672_v21, 4  ;;  %v752_v21 = vld.sshfl [vmem:[#allocation1 + $0x8] sm:$0xff pattern:$0x75316420] }
 0x1d1   :  { %1052 = vst [vmem:[#allocation1] ss:$2 sm:$0xff] %v2868_v0 }
 0x1d2   :  { %v682_v28 = vsel %vm675_vm3, %v681_v22, %v666_v26  ;;  %v757_v22 = vsel %vm116_vm0, %v752_v21, 0 }
 0x1d3   :  { %v686_v29 = vperm.slane %v682_v28, %v679_v25  ;;  %v920_v23 = vand.u32 4294901760, %v757_v22 }
 0x1d5   :  { %v687_v32 = vrot.slane %v686_v29, 4  ;;  %921 = vmatpush.msra.mxu0 %v920_v23  ;;  %v947_v24 = vsub.f32 %v757_v22, %v920_v23 }
 0x1d7   :  { %v688_v33 = vsel %vm675_vm3, %v687_v32, %v680_v31  ;;  %v948_v25 = vand.u32 4294901760, %v947_v24 }
 0x1d8   :  { %v692_v34 = vperm.slane %v688_v33, %v691_v30  ;;  %v1053_v28 = vld.sshfl [vmem:[#allocation1] sm:$0xff pattern:$0x75316420]  ;;  %v1054_v31 = vld.sshfl [vmem:[#allocation1 + $0x8] sm:$0xff pattern:$0x75316420] }
 0x1d9   :  { %v949_v26 = vsub.f32 %v947_v24, %v948_v25  ;;  %v1057_v29 = vsel %vm116_vm0, %v1053_v28, 0  ;;  %1357 = vst [vmem:[#allocation1] ss:$2 sm:$0xff] %v2881_v13 }
 0x1da   :  { %v696_v35 = vsel %vm695_vm4, %v692_v34, -inf  ;;  %v693_v36 = vrot.slane %v692_v34, 4  ;;  %v1076_v30 = vand.u32 4294901760, %v1057_v29 }
 0x1db   :  { %697 = vmax.xlane.f32.xlu0 %v696_v35  ;;  %v950_v27 = vand.u32 4294901760, %v949_v26 }
 0x1dc   :  { %v694_v37 = vsel %vm675_vm3, 0.0, %v693_v36  ;;  %v1103_v32 = vsub.f32 %v1057_v29, %v1076_v30  ;;  %v1059_v36 = vsel %vm116_vm0, %v1054_v31, 0 }
 0x1dd   :  { %v699_v38 = vsel %vm695_vm4, %v694_v37, -inf  ;;  %951 = vmatpush.msra.mxu1 %v950_v27 }
 0x1de   :  { %700 = vmax.xlane.f32.xlu1 %v699_v38  ;;  %v1104_v35 = vand.u32 4294901760, %v1103_v32 }
 0x1e0   :  { %v1105_v38 = vsub.f32 %v1103_v32, %v1104_v35 }
 0x1e2   :  { %v1106_v13 = vand.u32 4294901760, %v1105_v38 }
 0x24e   :  { %v698_v39 = vpop.xlane.xlu0 %697 }
 0x24f   :  { %v702_v40 = vsub.f32 %v692_v34, %v698_v39  ;;  %v1222_v39 = vand.u32 4294901760, %v1059_v36 }
 0x251   :  { %v704_v41 = vmul.f32 1.442695, %v702_v40  ;;  %v701_v42 = vpop.xlane.xlu1 %700 }
 0x252   :  { %v703_v43 = vsub.f32 %v694_v37, %v701_v42  ;;  %v1249_v42 = vsub.f32 %v1059_v36, %v1222_v39 }
 0x253   :  { %2629 = vpow2.f32 %v704_v41 }
 0x254   :  { %v706_v44 = vmul.f32 1.442695, %v703_v43 }
 0x256   :  { %2631 = vpow2.f32 %v706_v44  ;;  %v1358_v44 = vld.sshfl [vmem:[#allocation1] sm:$0xff pattern:$0x75316420] }
 0x259   :  { %v2630_v45 = vpop.eup %2629 }
 0x25a   :  { %v708_v46 = vsel %vm695_vm4, %v2630_v45, 0.0 }
 0x25b   :  { %709 = vadd.xlane.f32.xlu2 %v708_v46  ;;  %v1362_v46 = vsel %vm116_vm0, %v1358_v44, 0 }
 0x25c   :  { %v2632_v47 = vpop.eup %2631 }
 0x25d   :  { %v711_v48 = vsel %vm695_vm4, %v2632_v47, 0.0 }
 0x263   :  { %712 = vadd.xlane.f32.xlu2 %v711_v48 }
 0x2ce   :  { %v710_v49 = vpop.xlane.xlu2 %709 }
 0x2cf   :  { %2633 = vrcp.f32 %v710_v49  ;;  %v725_v54 = vand.u32 2147483648, %v710_v49  ;;  %v723_v56 = vand.u32 2147483647, %v710_v49  ;;  %vm719_vm6 = vweird.f32 %v710_v49 }
 0x2d1   :  { %v726_v59 = vor.u32 1.1754944e-38, %v725_v54  ;;  %vm724_vm8 = vcmp.eq.f32.partialorder %v723_v56, 8.507059e+37 }
 0x2d5   :  { %v2634_v50 = vpop.eup %2633 }
 0x2d6   :  { %v715_v51 = vmul.f32 %v2634_v50, %v710_v49  ;;  %v713_v52 = vpop.xlane.xlu2 %712  ;;  %vm720_vm5 = vweird.f32 %v2634_v50  ;;  %v1381_v49 = vand.u32 4294901760, %v1362_v46 }
 0x2d7   :  { %2635 = vrcp.f32 %v713_v52  ;;  %vm721_vm7 = vmor %vm719_vm6, %vm720_vm5  ;;  %v740_v4 = vand.u32 2147483648, %v713_v52  ;;  %v738_v6 = vand.u32 2147483647, %v713_v52  ;;  %vm734_vm10 = vweird.f32 %v713_v52 }
 0x2d8   :  { %v716_v53 = vsub.f32 1.0, %v715_v51  ;;  %v1359_v51 = vld.sshfl [vmem:[#allocation1 + $0x8] sm:$0xff pattern:$0x75316420] }
 0x2d9   :  { %v741_v8 = vor.u32 1.1754944e-38, %v740_v4  ;;  %vm739_vm12 = vcmp.eq.f32.partialorder %v738_v6, 8.507059e+37  ;;  %1674 = vst [vmem:[#allocation1] ss:$2 sm:$0xff] %v2874_v3 }
 0x2da   :  { %v717_v55 = vmul.f32 %v2634_v50, %v716_v53  ;;  %v1408_v53 = vsub.f32 %v1362_v46, %v1381_v49 }
 0x2dc   :  { %v718_v57 = vadd.f32 %v2634_v50, %v717_v55  ;;  %v1409_v55 = vand.u32 4294901760, %v1408_v53 }
 0x2dd   :  { %v2636_v58 = vpop.eup %2635 }
 0x2de   :  { %v730_v60 = vmul.f32 %v2636_v58, %v713_v52  ;;  %v722_v61 = vsel %vm721_vm7, %v2634_v50, %v718_v57  ;;  %vm735_vm9 = vweird.f32 %v2636_v58  ;;  %v1364_v57 = vsel %vm116_vm0, %v1359_v51, 0 }
 0x2df   :  { %v727_v62 = vsel %vm724_vm8, %v726_v59, %v722_v61  ;;  %vm736_vm11 = vmor %vm734_vm10, %vm735_vm9  ;;  %v1527_v59 = vand.u32 4294901760, %v1364_v57 }
 0x2e0   :  { %v731_v63 = vsub.f32 1.0, %v730_v60  ;;  %v2918_v2 = vmul.f32 %v2630_v45, %v727_v62  ;;  %v1250_v45 = vand.u32 4294901760, %v1249_v42 }
 0x2e1   :  { %v1554_v61 = vsub.f32 %v1364_v57, %v1527_v59 }
 0x2e2   :  { %v732_v5 = vmul.f32 %v2636_v58, %v731_v63  ;;  %747 = vrot.lane.b32.xlu0 %v2918_v2, %s2801_s6  ;;  %1354 = vrot.lane.b32.xlu1 %v2918_v2, %s2802_s29  ;;  %v1251_v48 = vsub.f32 %v1249_v42, %v1250_v45  ;;  %v1675_v63 = vld.sshfl [vmem:[#allocation1] sm:$0xff pattern:$0x75316420] }
 0x2e3   :  { %v1555_v4 = vand.u32 4294901760, %v1554_v61 }
 0x2e4   :  { %v733_v7 = vadd.f32 %v2636_v58, %v732_v5  ;;  %v1252_v52 = vand.u32 4294901760, %v1251_v48  ;;  %v1679_v5 = vsel %vm116_vm0, %v1675_v63, 0 }
 0x2e6   :  { %v737_v9 = vsel %vm736_vm11, %v2636_v58, %v733_v7  ;;  %v1410_v58 = vsub.f32 %v1408_v53, %v1409_v55  ;;  %v1556_v7 = vsub.f32 %v1554_v61, %v1555_v4 }
 0x2e7   :  { %v742_v10 = vsel %vm739_vm12, %v741_v8, %v737_v9  ;;  %v1698_v8 = vand.u32 4294901760, %v1679_v5 }
 0x2e8   :  { %v2922_v11 = vmul.f32 %v2632_v47, %v742_v10  ;;  %v1055_v47 = vsel %vm193_vm2, %v2918_v2, 0  ;;  %v1411_v60 = vand.u32 4294901760, %v1410_v58  ;;  %v1676_v10 = vld.sshfl [vmem:[#allocation1 + $0x8] sm:$0xff pattern:$0x75316420]  ;;  %v1557_v12 = vand.u32 4294901760, %v1556_v7 }
 0x2e9   :  { %v1078_v50 = vand.u32 4294901760, %v1055_v47  ;;  %1976 = vst [vmem:[#allocation1] ss:$2 sm:$0xff] %v2871_v1  ;;  %v1725_v15 = vsub.f32 %v1679_v5, %v1698_v8  ;;  %v1681_v19 = vsel %vm116_vm0, %v1676_v10, 0 }
 0x2ea   :  { %2279 = vrot.lane.b32.xlu0 %v2922_v11, %s2802_s29  ;;  %1671 = vrot.lane.b32.xlu2 %v2922_v11, %s2801_s6  ;;  %v1844_v21 = vand.u32 4294901760, %v1681_v19  ;;  %v1979_v46 = vsel %vm193_vm2, %v2922_v11, 0 }
 0x2eb   :  { %v1079_v54 = vsub.f32 %v1055_v47, %v1078_v50  ;;  %v1726_v17 = vand.u32 4294901760, %v1725_v15 }
 0x2ed   :  { %v1080_v56 = vand.u32 4294901760, %v1079_v54  ;;  %v1727_v20 = vsub.f32 %v1725_v15, %v1726_v17 }
 0x2ef   :  { %v1081_v3 = vsub.f32 %v1079_v54, %v1080_v56  ;;  %v1728_v22 = vand.u32 4294901760, %v1727_v20 }
 0x2f1   :  { %v1082_v62 = vand.u32 4294901760, %v1081_v3 }
 0x344   :  { %v1672_v26 = vpop.permute.xlu2 %1671 }
 0x345   :  { %v1677_v29 = vsel %vm193_vm2, %v1672_v26, 0 }
 0x354   :  { %v748_v33 = vpop.permute.xlu0 %747  ;;  %v1355_v2 = vpop.permute.xlu1 %1354 }
 0x355   :  { %v753_v34 = vsel %vm193_vm2, %v748_v33, 0  ;;  %v1360_v6 = vsel %vm193_vm2, %v1355_v2, 0  ;;  %v1978_v33 = vld.sshfl [vmem:[#allocation1 + $0x8] sm:$0xff pattern:$0x75316420] }
 0x356   :  { %v776_v0 = vand.u32 4294901760, %v753_v34  ;;  %v1383_v9 = vand.u32 4294901760, %v1360_v6  ;;  %v1983_v38 = vsel %vm116_vm0, %v1978_v33, 0 }
 0x358   :  { %v777_v37 = vsub.f32 %v753_v34, %v776_v0  ;;  %807 = vmatmul.f32.vlgmr.msra.gmra.mxu3 %v776_v0  ;;  %v1384_v16 = vsub.f32 %v1360_v6, %v1383_v9 }
 0x359   :  { %997 = vmatpush.msra.mxu3 %v920_v23 }
 0x35a   :  { %831 = vmatmul.f32.vlgmr.msrb.gmra.mxu0 %v777_v37  ;;  %v778_v40 = vand.u32 4294901760, %v777_v37  ;;  %v1385_v18 = vand.u32 4294901760, %v1384_v16 }
 0x35b   :  { %1023 = vmatpush.msrb.mxu0 %v948_v25  ;;  %v1977_v25 = vld.sshfl [vmem:[#allocation1] sm:$0xff pattern:$0x75316420] }
 0x35c   :  { %855 = vmatmul.f32.vlgmr.msrb.gmra.mxu1 %v778_v40  ;;  %v779_v41 = vsub.f32 %v777_v37, %v778_v40  ;;  %v1386_v1 = vsub.f32 %v1384_v16, %v1385_v18  ;;  %v1981_v28 = vsel %vm116_vm0, %v1977_v25, 0  ;;  %2282 = vst [vmem:[#allocation1] ss:$2 sm:$0xff] %v2883_v14 }
 0x35d   :  { %1045 = vmatpush.msrb.mxu1 %v920_v23  ;;  %v1871_v23 = vsub.f32 %v1681_v19, %v1844_v21  ;;  %v2000_v31 = vand.u32 4294901760, %v1981_v28 }
 0x35e   :  { %v780_v43 = vand.u32 4294901760, %v779_v41 }
 0x35f   :  { %v1872_v27 = vand.u32 4294901760, %v1871_v23 }
 0x360   :  { %781 = vmatmul.f32.vlgmr.msra.gmra.mxu2 %v780_v43  ;;  %901 = vmatmul.f32.vlgmr.msrb.gmra.mxu3 %v776_v0 }
 0x361   :  { %974 = vmatpush.msra.mxu2 %v947_v24  ;;  %1107 = vmatpush.msrb.mxu3 %v1106_v13  ;;  %v1387_v24 = vand.u32 4294901760, %v1386_v1 }
 0x362   :  { %927 = vmatmul.f32.vlgmr.msra.gmra.mxu0 %v780_v43 }
 0x363   :  { %1130 = vmatpush.msra.mxu0 %v1103_v32  ;;  %v1700_v32 = vand.u32 4294901760, %v1677_v29  ;;  %v2283_v43 = vld.sshfl [vmem:[#allocation1] sm:$0xff pattern:$0x75316420] }
 0x364   :  { %953 = vmatmul.f32.vlgmr.msra.gmra.mxu1 %v776_v0 }
 0x365   :  { %1153 = vmatpush.msra.mxu1 %v1076_v30 }
 0x368   :  { %879 = vmatmul.f32.vlgmr.msrb.gmra.mxu2 %v776_v0  ;;  %1001 = vmatmul.f32.vlgmr.msra.gmra.mxu3 %v778_v40  ;;  %v2146_v40 = vand.u32 4294901760, %v1983_v38 }
 0x369   :  { %1077 = vmatpush.msrb.mxu2 %v1076_v30  ;;  %1201 = vmatpush.msra.mxu3 %v1076_v30  ;;  %v1873_v30 = vsub.f32 %v1871_v23, %v1872_v27 }
 0x36a   :  { %1025 = vmatmul.f32.vlgmr.msrb.gmra.mxu0 %v776_v0  ;;  %v2173_v13 = vsub.f32 %v1983_v38, %v2146_v40 }
 0x36b   :  { %1223 = vmatpush.msrb.mxu0 %v1222_v39  ;;  %v1874_v34 = vand.u32 4294901760, %v1873_v30 }
 0x36c   :  { %1047 = vmatmul.f32.vlgmr.msrb.gmra.mxu1 %v776_v0  ;;  %v1701_v0 = vsub.f32 %v1677_v29, %v1700_v32  ;;  %v2174_v44 = vand.u32 4294901760, %v2173_v13 }
 0x36d   :  { %1253 = vmatpush.msrb.mxu1 %v1252_v52 }
 0x36e   :  { %v2175_v47 = vsub.f32 %v2173_v13, %v2174_v44 }
 0x370   :  { %977 = vmatmul.f32.vlgmr.msra.gmra.mxu2 %v777_v37  ;;  %1109 = vmatmul.f32.vlgmr.msrb.gmra.mxu3 %v1078_v50  ;;  %v1702_v37 = vand.u32 4294901760, %v1701_v0 }
 0x371   :  { %1179 = vmatpush.msra.mxu2 %v1104_v35  ;;  %1299 = vmatpush.msrb.mxu3 %v1222_v39  ;;  %v2027_v35 = vsub.f32 %v1981_v28, %v2000_v31 }
 0x372   :  { %1133 = vmatmul.f32.vlgmr.msra.gmra.mxu0 %v1079_v54  ;;  %v1703_v14 = vsub.f32 %v1701_v0, %v1702_v37 }
 0x373   :  { %1325 = vmatpush.msra.mxu0 %v1250_v45  ;;  %v2028_v36 = vand.u32 4294901760, %v2027_v35  ;;  %v2287_v45 = vsel %vm116_vm0, %v2283_v43, 0 }
 0x374   :  { %1157 = vmatmul.f32.vlgmr.msra.gmra.mxu1 %v1080_v56  ;;  %v2306_v48 = vand.u32 4294901760, %v2287_v45 }
 0x375   :  { %1347 = vmatpush.msra.mxu1 %v1222_v39  ;;  %v2029_v39 = vsub.f32 %v2027_v35, %v2028_v36 }
 0x376   :  { %v2333_v51 = vsub.f32 %v2287_v45, %v2306_v48 }
 0x377   :  { %v2030_v41 = vand.u32 4294901760, %v2029_v39 }
 0x378   :  { %1083 = vmatmul.f32.vlgmr.msrb.gmra.mxu2 %v1082_v62  ;;  %1203 = vmatmul.f32.vlgmr.msra.gmra.mxu3 %v1078_v50 }
 0x379   :  { %1276 = vmatpush.msrb.mxu2 %v1249_v42  ;;  %1412 = vmatpush.msra.mxu3 %v1411_v60  ;;  %v1704_v42 = vand.u32 4294901760, %v1703_v14 }
 0x37a   :  { %1229 = vmatmul.f32.vlgmr.msrb.gmra.mxu0 %v1082_v62 }
 0x37b   :  { %1435 = vmatpush.msrb.mxu0 %v1408_v53  ;;  %v2284_v53 = vld.sshfl [vmem:[#allocation1 + $0x8] sm:$0xff pattern:$0x75316420] }
 0x37c   :  { %1255 = vmatmul.f32.vlgmr.msrb.gmra.mxu1 %v1078_v50 }
 0x37d   :  { %1458 = vmatpush.msrb.mxu1 %v1381_v49 }
 0x380   :  { %1181 = vmatmul.f32.vlgmr.msra.gmra.mxu2 %v1078_v50  ;;  %1303 = vmatmul.f32.vlgmr.msrb.gmra.mxu3 %v1080_v56 }
 0x381   :  { %1382 = vmatpush.msra.mxu2 %v1381_v49  ;;  %1506 = vmatpush.msrb.mxu3 %v1381_v49  ;;  %v2002_v49 = vand.u32 4294901760, %v1979_v46 }
 0x382   :  { %1327 = vmatmul.f32.vlgmr.msra.gmra.mxu0 %v1078_v50 }
 0x383   :  { %1528 = vmatpush.msra.mxu0 %v1527_v59  ;;  %v2003_v52 = vsub.f32 %v1979_v46, %v2002_v49 }
 0x384   :  { %1349 = vmatmul.f32.vlgmr.msra.gmra.mxu1 %v1078_v50  ;;  %v2176_v50 = vand.u32 4294901760, %v2175_v47 }
 0x385   :  { %1558 = vmatpush.msra.mxu1 %v1557_v12  ;;  %v2004_v11 = vand.u32 4294901760, %v2003_v52 }
 0x387   :  { %v2005_v58 = vsub.f32 %v2003_v52, %v2004_v11 }
 0x388   :  { %1279 = vmatmul.f32.vlgmr.msrb.gmra.mxu2 %v1079_v54  ;;  %1414 = vmatmul.f32.vlgmr.msra.gmra.mxu3 %v1383_v9  ;;  %v2334_v54 = vand.u32 4294901760, %v2333_v51 }
 0x389   :  { %1484 = vmatpush.msrb.mxu2 %v1409_v55  ;;  %1604 = vmatpush.msra.mxu3 %v1527_v59  ;;  %v2289_v55 = vsel %vm116_vm0, %v2284_v53, 0  ;;  %v2006_v60 = vand.u32 4294901760, %v2005_v58 }
 0x38a   :  { %1438 = vmatmul.f32.vlgmr.msrb.gmra.mxu0 %v1384_v16  ;;  %v2335_v56 = vsub.f32 %v2333_v51, %v2334_v54  ;;  %v2452_v57 = vand.u32 4294901760, %v2289_v55 }
 0x38b   :  { %1630 = vmatpush.msrb.mxu0 %v1555_v4 }
 0x38c   :  { %1462 = vmatmul.f32.vlgmr.msrb.gmra.mxu1 %v1385_v18  ;;  %v2479_v3 = vsub.f32 %v2289_v55, %v2452_v57 }
 0x38d   :  { %1652 = vmatpush.msrb.mxu1 %v1527_v59  ;;  %v2336_v59 = vand.u32 4294901760, %v2335_v56 }
 0x38e   :  { %v2480_v62 = vand.u32 4294901760, %v2479_v3 }
 0x390   :  { %1388 = vmatmul.f32.vlgmr.msra.gmra.mxu2 %v1387_v24  ;;  %1508 = vmatmul.f32.vlgmr.msrb.gmra.mxu3 %v1383_v9  ;;  %v2481_v2 = vsub.f32 %v2479_v3, %v2480_v62 }
 0x391   :  { %1581 = vmatpush.msra.mxu2 %v1554_v61  ;;  %1729 = vmatpush.msrb.mxu3 %v1728_v22  ;;  %v2280_v61 = vpop.permute.xlu0 %2279 }
 0x392   :  { %1534 = vmatmul.f32.vlgmr.msra.gmra.mxu0 %v1387_v24  ;;  %v2285_v63 = vsel %vm193_vm2, %v2280_v61, 0  ;;  %v2482_v5 = vand.u32 4294901760, %v2481_v2 }
 0x393   :  { %1752 = vmatpush.msra.mxu0 %v1725_v15  ;;  %v2308_v4 = vand.u32 4294901760, %v2285_v63 }
 0x394   :  { %1560 = vmatmul.f32.vlgmr.msra.gmra.mxu1 %v1383_v9 }
 0x395   :  { %1775 = vmatpush.msra.mxu1 %v1698_v8  ;;  %v2309_v6 = vsub.f32 %v2285_v63, %v2308_v4 }
 0x397   :  { %v2310_v7 = vand.u32 4294901760, %v2309_v6 }
 0x398   :  { %1486 = vmatmul.f32.vlgmr.msrb.gmra.mxu2 %v1383_v9  ;;  %1608 = vmatmul.f32.vlgmr.msra.gmra.mxu3 %v1385_v18 }
 0x399   :  { %1699 = vmatpush.msrb.mxu2 %v1698_v8  ;;  %1823 = vmatpush.msra.mxu3 %v1698_v8  ;;  %v2311_v8 = vsub.f32 %v2309_v6, %v2310_v7 }
 0x39a   :  { %1632 = vmatmul.f32.vlgmr.msrb.gmra.mxu0 %v1383_v9 }
 0x39b   :  { %1845 = vmatpush.msrb.mxu0 %v1844_v21 }
 0x39c   :  { %1654 = vmatmul.f32.vlgmr.msrb.gmra.mxu1 %v1383_v9  ;;  %v2312_v9 = vand.u32 4294901760, %v2311_v8 }
 0x39d   :  { %1875 = vmatpush.msrb.mxu1 %v1874_v34 }
 0x3a0   :  { %1584 = vmatmul.f32.vlgmr.msra.gmra.mxu2 %v1384_v16  ;;  %1731 = vmatmul.f32.vlgmr.msrb.gmra.mxu3 %v1700_v32 }
 0x3a1   :  { %1801 = vmatpush.msra.mxu2 %v1726_v17  ;;  %1921 = vmatpush.msrb.mxu3 %v1844_v21 }
 0x3a2   :  { %1755 = vmatmul.f32.vlgmr.msra.gmra.mxu0 %v1701_v0 }
 0x3a3   :  { %1947 = vmatpush.msra.mxu0 %v1872_v27 }
 0x3a4   :  { %1779 = vmatmul.f32.vlgmr.msra.gmra.mxu1 %v1702_v37 }
 0x3a5   :  { %1969 = vmatpush.msra.mxu1 %v1844_v21 }
 0x3a8   :  { %1705 = vmatmul.f32.vlgmr.msrb.gmra.mxu2 %v1704_v42  ;;  %1825 = vmatmul.f32.vlgmr.msra.gmra.mxu3 %v1700_v32 }
 0x3a9   :  { %1898 = vmatpush.msrb.mxu2 %v1871_v23  ;;  %2031 = vmatpush.msra.mxu3 %v2030_v41 }
 0x3aa   :  { %1851 = vmatmul.f32.vlgmr.msrb.gmra.mxu0 %v1704_v42 }
 0x3ab   :  { %2054 = vmatpush.msrb.mxu0 %v2027_v35 }
 0x3ac   :  { %1877 = vmatmul.f32.vlgmr.msrb.gmra.mxu1 %v1700_v32 }
 0x3ad   :  { %2077 = vmatpush.msrb.mxu1 %v2000_v31 }
 0x3b0   :  { %1803 = vmatmul.f32.vlgmr.msra.gmra.mxu2 %v1700_v32  ;;  %1925 = vmatmul.f32.vlgmr.msrb.gmra.mxu3 %v1702_v37 }
 0x3b1   :  { %2001 = vmatpush.msra.mxu2 %v2000_v31  ;;  %2125 = vmatpush.msrb.mxu3 %v2000_v31 }
 0x3b2   :  { %1949 = vmatmul.f32.vlgmr.msra.gmra.mxu0 %v1700_v32 }
 0x3b3   :  { %2147 = vmatpush.msra.mxu0 %v2146_v40 }
 0x3b4   :  { %1971 = vmatmul.f32.vlgmr.msra.gmra.mxu1 %v1700_v32 }
 0x3b5   :  { %2177 = vmatpush.msra.mxu1 %v2176_v50 }
 0x3b8   :  { %1901 = vmatmul.f32.vlgmr.msrb.gmra.mxu2 %v1701_v0  ;;  %2033 = vmatmul.f32.vlgmr.msra.gmra.mxu3 %v2002_v49 }
 0x3b9   :  { %2103 = vmatpush.msrb.mxu2 %v2028_v36  ;;  %2223 = vmatpush.msra.mxu3 %v2146_v40 }
 0x3ba   :  { %2057 = vmatmul.f32.vlgmr.msrb.gmra.mxu0 %v2003_v52 }
 0x3bb   :  { %2249 = vmatpush.msrb.mxu0 %v2174_v44 }
 0x3bc   :  { %2081 = vmatmul.f32.vlgmr.msrb.gmra.mxu1 %v2004_v11 }
 0x3bd   :  { %2271 = vmatpush.msrb.mxu1 %v2146_v40 }
 0x3c0   :  { %2007 = vmatmul.f32.vlgmr.msra.gmra.mxu2 %v2006_v60  ;;  %2127 = vmatmul.f32.vlgmr.msrb.gmra.mxu3 %v2002_v49 }
 0x3c1   :  { %2200 = vmatpush.msra.mxu2 %v2173_v13  ;;  %2337 = vmatpush.msrb.mxu3 %v2336_v59 }
 0x3c2   :  { %2153 = vmatmul.f32.vlgmr.msra.gmra.mxu0 %v2006_v60 }
 0x3c3   :  { %2360 = vmatpush.msra.mxu0 %v2333_v51 }
 0x3c4   :  { %2179 = vmatmul.f32.vlgmr.msra.gmra.mxu1 %v2002_v49 }
 0x3c5   :  { %2383 = vmatpush.msra.mxu1 %v2306_v48 }
 0x3c8   :  { %2105 = vmatmul.f32.vlgmr.msrb.gmra.mxu2 %v2002_v49  ;;  %2227 = vmatmul.f32.vlgmr.msra.gmra.mxu3 %v2004_v11 }
 0x3c9   :  { %2307 = vmatpush.msrb.mxu2 %v2306_v48  ;;  %2431 = vmatpush.msra.mxu3 %v2306_v48 }
 0x3ca   :  { %2251 = vmatmul.f32.vlgmr.msrb.gmra.mxu0 %v2002_v49 }
 0x3cb   :  { %2453 = vmatpush.msrb.mxu0 %v2452_v57 }
 0x3cc   :  { %2273 = vmatmul.f32.vlgmr.msrb.gmra.mxu1 %v2002_v49 }
 0x3cd   :  { %2483 = vmatpush.msrb.mxu1 %v2482_v5 }
 0x3d0   :  { %2203 = vmatmul.f32.vlgmr.msra.gmra.mxu2 %v2003_v52  ;;  %2339 = vmatmul.f32.vlgmr.msrb.gmra.mxu3 %v2308_v4 }
 0x3d1   :  { %2409 = vmatpush.msra.mxu2 %v2334_v54  ;;  %2529 = vmatpush.msrb.mxu3 %v2452_v57 }
 0x3d2   :  { %2363 = vmatmul.f32.vlgmr.msra.gmra.mxu0 %v2309_v6 }
 0x3d3   :  { %2555 = vmatpush.msra.mxu0 %v2480_v62 }
 0x3d4   :  { %2387 = vmatmul.f32.vlgmr.msra.gmra.mxu1 %v2310_v7 }
 0x3d5   :  { %2577 = vmatpush.msra.mxu1 %v2452_v57 }
 0x3d7   :  { %v832_v10 = vpop.f32.mrf.mxu0 }
 0x3d8   :  { %2313 = vmatmul.f32.vlgmr.msrb.gmra.mxu2 %v2312_v9  ;;  %2433 = vmatmul.f32.vlgmr.msra.gmra.mxu3 %v2308_v4 }
 0x3d9   :  { %v856_v12 = vpop.f32.mrf.mxu1  ;;  %2506 = vmatpush.msrb.mxu2 %v2479_v3 }
 0x3da   :  { %2459 = vmatmul.f32.vlgmr.msrb.gmra.mxu0 %v2312_v9 }
 0x3db   :  { %v808_v15 = vpop.f32.mrf.mxu3 }
 0x3dc   :  { %2485 = vmatmul.f32.vlgmr.msrb.gmra.mxu1 %v2308_v4 }
 0x3df   :  { %v928_v16 = vpop.f32.mrf.mxu0 }
 0x3e0   :  { %2411 = vmatmul.f32.vlgmr.msra.gmra.mxu2 %v2308_v4  ;;  %2533 = vmatmul.f32.vlgmr.msrb.gmra.mxu3 %v2310_v7 }
 0x3e1   :  { %v954_v17 = vpop.f32.mrf.mxu1 }
 0x3e2   :  { %2557 = vmatmul.f32.vlgmr.msra.gmra.mxu0 %v2308_v4  ;;  %v955_v35 = vadd.f32 %v954_v17, %v928_v16 }
 0x3e3   :  { %v782_v18 = vpop.f32.mrf.mxu2  ;;  %v902_v19 = vpop.f32.mrf.mxu3 }
 0x3e4   :  { %2579 = vmatmul.f32.vlgmr.msra.gmra.mxu1 %v2308_v4  ;;  %v809_v36 = vadd.f32 %v808_v15, %v782_v18 }
 0x3e6   :  { %v833_v14 = vadd.f32 %v832_v10, %v809_v36 }
 0x3e7   :  { %v1026_v20 = vpop.f32.mrf.mxu0 }
 0x3e8   :  { %2509 = vmatmul.f32.vlgmr.msrb.gmra.mxu2 %v2309_v6  ;;  %v857_v42 = vadd.f32 %v856_v12, %v833_v14 }
 0x3e9   :  { %v1048_v21 = vpop.f32.mrf.mxu1 }
 0x3eb   :  { %v880_v1 = vpop.f32.mrf.mxu2  ;;  %v1002_v22 = vpop.f32.mrf.mxu3 }
 0x3ec   :  { %v881_v45 = vadd.f32 %v880_v1, %v857_v42 }
 0x3ee   :  { %v903_v49 = vadd.f32 %v902_v19, %v881_v45 }
 0x3ef   :  { %v1134_v23 = vpop.f32.mrf.mxu0 }
 0x3f1   :  { %v1158_v24 = vpop.f32.mrf.mxu1 }
 0x3f3   :  { %v978_v25 = vpop.f32.mrf.mxu2  ;;  %v1110_v26 = vpop.f32.mrf.mxu3 }
 0x3f4   :  { %v979_v37 = vadd.f32 %v978_v25, %v955_v35 }
 0x3f6   :  { %v1003_v41 = vadd.f32 %v1002_v22, %v979_v37 }
 0x3f7   :  { %v1230_v27 = vpop.f32.mrf.mxu0 }
 0x3f8   :  { %v1027_v43 = vadd.f32 %v1026_v20, %v1003_v41 }
 0x3f9   :  { %v1256_v28 = vpop.f32.mrf.mxu1 }
 0x3fa   :  { %v1049_v48 = vadd.f32 %v1048_v21, %v1027_v43 }
 0x3fb   :  { %v1084_v29 = vpop.f32.mrf.mxu2  ;;  %v1204_v30 = vpop.f32.mrf.mxu3 }
 0x3fc   :  { %v1231_v51 = vadd.f32 %v1230_v27, %v1049_v48  ;;  %v1085_v52 = vadd.f32 %v1084_v29, %v903_v49 }
 0x3fe   :  { %v1257_v55 = vadd.f32 %v1256_v28, %v1231_v51  ;;  %v1111_v56 = vadd.f32 %v1110_v26, %v1085_v52 }
 0x3ff   :  { %v1328_v31 = vpop.f32.mrf.mxu0 }
 0x400   :  { %v1135_v3 = vadd.f32 %v1134_v23, %v1111_v56 }
 0x401   :  { %v1350_v32 = vpop.f32.mrf.mxu1 }
 0x402   :  { %v1159_v5 = vadd.f32 %v1158_v24, %v1135_v3 }
 0x403   :  { %v1182_v33 = vpop.f32.mrf.mxu2  ;;  %v1304_v34 = vpop.f32.mrf.mxu3 }
 0x404   :  { %v1183_v12 = vadd.f32 %v1182_v33, %v1159_v5 }
 0x406   :  { %v1205_v22 = vadd.f32 %v1204_v30, %v1183_v12 }
 0x407   :  { %v1439_v0 = vpop.f32.mrf.mxu0 }
 0x409   :  { %v1463_v38 = vpop.f32.mrf.mxu1 }
 0x40b   :  { %v1280_v39 = vpop.f32.mrf.mxu2  ;;  %v1415_v40 = vpop.f32.mrf.mxu3 }
 0x40c   :  { %v1281_v58 = vadd.f32 %v1280_v39, %v1257_v55 }
 0x40e   :  { %v1305_v62 = vadd.f32 %v1304_v34, %v1281_v58 }
 0x40f   :  { %v1535_v13 = vpop.f32.mrf.mxu0 }
 0x410   :  { %v1329_v8 = vadd.f32 %v1328_v31, %v1305_v62 }
 0x411   :  { %v1561_v44 = vpop.f32.mrf.mxu1 }
 0x412   :  { %v1562_v63 = vadd.f32 %v1561_v44, %v1535_v13  ;;  %v1351_v17 = vadd.f32 %v1350_v32, %v1329_v8 }
 0x413   :  { %v1389_v46 = vpop.f32.mrf.mxu2  ;;  %v1509_v47 = vpop.f32.mrf.mxu3 }
 0x414   :  { %v1416_v57 = vadd.f32 %v1415_v40, %v1389_v46 }
 0x416   :  { %v1440_v60 = vadd.f32 %v1439_v0, %v1416_v57 }
 0x417   :  { %v1633_v50 = vpop.f32.mrf.mxu0 }
 0x418   :  { %v1464_v6 = vadd.f32 %v1463_v38, %v1440_v60 }
 0x419   :  { %v1655_v53 = vpop.f32.mrf.mxu1 }
 0x41b   :  { %v1487_v54 = vpop.f32.mrf.mxu2  ;;  %v1609_v11 = vpop.f32.mrf.mxu3 }
 0x41c   :  { %v1488_v9 = vadd.f32 %v1487_v54, %v1464_v6 }
 0x41e   :  { %v1510_v18 = vadd.f32 %v1509_v47, %v1488_v9 }
 0x41f   :  { %v1756_v59 = vpop.f32.mrf.mxu0 }
 0x420   :  { %v1658_v25 = vadd.f32 %v1510_v18, %v1205_v22 }
 0x421   :  { %v1780_v61 = vpop.f32.mrf.mxu1 }
 0x423   :  { %v1585_v2 = vpop.f32.mrf.mxu2  ;;  %v1732_v4 = vpop.f32.mrf.mxu3 }
 0x424   :  { %v1586_v7 = vadd.f32 %v1585_v2, %v1562_v63 }
 0x426   :  { %v1610_v10 = vadd.f32 %v1609_v11, %v1586_v7 }
 0x427   :  { %v1852_v16 = vpop.f32.mrf.mxu0 }
 0x428   :  { %v1634_v15 = vadd.f32 %v1633_v50, %v1610_v10 }
 0x429   :  { %v1878_v20 = vpop.f32.mrf.mxu1 }
 0x42a   :  { %v1656_v19 = vadd.f32 %v1655_v53, %v1634_v15  ;;  %v1879_v30 = vadd.f32 %v1878_v20, %v1852_v16 }
 0x42b   :  { %v1706_v21 = vpop.f32.mrf.mxu2  ;;  %v1826_v1 = vpop.f32.mrf.mxu3 }
 0x42c   :  { %v1659_v23 = vadd.f32 %v1656_v19, %v1351_v17  ;;  %v1733_v14 = vadd.f32 %v1732_v4, %v1706_v21 }
 0x42e   :  { %v1662_v26 = vrot.slane %v1659_v23, 4  ;;  %v1757_v44 = vadd.f32 %v1756_v59, %v1733_v14 }
 0x42f   :  { %v1950_v27 = vpop.f32.mrf.mxu0 }
 0x430   :  { %v1663_v24 = vsel %vm116_vm0, %v1658_v25, %v1662_v26  ;;  %v1781_v46 = vadd.f32 %v1780_v61, %v1757_v44 }
 0x431   :  { %1665 = vst [vmem:[#allocation11] sm:$0xff] %v1663_v24  ;;  %v1972_v31 = vpop.f32.mrf.mxu1 }
 0x433   :  { %v1804_v28 = vpop.f32.mrf.mxu2  ;;  %v1926_v29 = vpop.f32.mrf.mxu3 }
 0x434   :  { %v1805_v49 = vadd.f32 %v1804_v28, %v1781_v46 }
 0x436   :  { %v1827_v54 = vadd.f32 %v1826_v1, %v1805_v49 }
 0x437   :  { %v2058_v35 = vpop.f32.mrf.mxu0 }
 0x439   :  { %v2082_v32 = vpop.f32.mrf.mxu1 }
 0x43b   :  { %v1902_v33 = vpop.f32.mrf.mxu2  ;;  %v2034_v34 = vpop.f32.mrf.mxu3 }
 0x43c   :  { %v1903_v41 = vadd.f32 %v1902_v33, %v1879_v30 }
 0x43e   :  { %v1927_v45 = vadd.f32 %v1926_v29, %v1903_v41 }
 0x43f   :  { %v2154_v37 = vpop.f32.mrf.mxu0 }
 0x440   :  { %v1951_v47 = vadd.f32 %v1950_v27, %v1927_v45 }
 0x441   :  { %v2180_v38 = vpop.f32.mrf.mxu1 }
 0x442   :  { %v1973_v52 = vadd.f32 %v1972_v31, %v1951_v47 }
 0x443   :  { %v2008_v0 = vpop.f32.mrf.mxu2  ;;  %v2128_v36 = vpop.f32.mrf.mxu3 }
 0x444   :  { %v2155_v11 = vadd.f32 %v2154_v37, %v1973_v52  ;;  %v2009_v55 = vadd.f32 %v2008_v0, %v1827_v54 }
 0x446   :  { %v2181_v58 = vadd.f32 %v2180_v38, %v2155_v11  ;;  %v2035_v3 = vadd.f32 %v2034_v34, %v2009_v55 }
 0x447   :  { %v2252_v13 = vpop.f32.mrf.mxu0 }
 0x448   :  { %v2059_v2 = vadd.f32 %v2058_v35, %v2035_v3 }
 0x449   :  { %v2274_v42 = vpop.f32.mrf.mxu1 }
 0x44a   :  { %v2083_v7 = vadd.f32 %v2082_v32, %v2059_v2 }
 0x44b   :  { %v2106_v39 = vpop.f32.mrf.mxu2  ;;  %v2228_v40 = vpop.f32.mrf.mxu3 }
 0x44c   :  { %v2107_v18 = vadd.f32 %v2106_v39, %v2083_v7 }
 0x44e   :  { %v2129_v23 = vadd.f32 %v2128_v36, %v2107_v18 }
 0x44f   :  { %v2364_v50 = vpop.f32.mrf.mxu0 }
 0x451   :  { %v2388_v53 = vpop.f32.mrf.mxu1 }
 0x453   :  { %v2204_v43 = vpop.f32.mrf.mxu2  ;;  %v2340_v48 = vpop.f32.mrf.mxu3 }
 0x454   :  { %v2205_v63 = vadd.f32 %v2204_v43, %v2181_v58 }
 0x456   :  { %v2229_v4 = vadd.f32 %v2228_v40, %v2205_v63 }
 0x457   :  { %v2460_v62 = vpop.f32.mrf.mxu0 }
 0x458   :  { %v2253_v12 = vadd.f32 %v2252_v13, %v2229_v4 }
 0x459   :  { %v2486_v59 = vpop.f32.mrf.mxu1 }
 0x45a   :  { %v2487_v5 = vadd.f32 %v2486_v59, %v2460_v62  ;;  %v2275_v21 = vadd.f32 %v2274_v42, %v2253_v12 }
 0x45b   :  { %v2314_v51 = vpop.f32.mrf.mxu2  ;;  %v2434_v56 = vpop.f32.mrf.mxu3 }
 0x45c   :  { %v2341_v60 = vadd.f32 %v2340_v48, %v2314_v51 }
 0x45e   :  { %v2365_v61 = vadd.f32 %v2364_v50, %v2341_v60 }
 0x45f   :  { %v2558_v17 = vpop.f32.mrf.mxu0 }
 0x460   :  { %v2389_v8 = vadd.f32 %v2388_v53, %v2365_v61 }
 0x461   :  { %v2580_v20 = vpop.f32.mrf.mxu1 }
 0x463   :  { %v2412_v57 = vpop.f32.mrf.mxu2  ;;  %v2534_v10 = vpop.f32.mrf.mxu3 }
 0x464   :  { %v2413_v15 = vadd.f32 %v2412_v57, %v2389_v8 }
 0x466   :  { %v2435_v1 = vadd.f32 %v2434_v56, %v2413_v15 }
 0x468   :  { %v2583_v26 = vadd.f32 %v2435_v1, %v2129_v23 }
 0x46b   :  { %v2510_v6 = vpop.f32.mrf.mxu2 }
 0x46c   :  { %v2511_v9 = vadd.f32 %v2510_v6, %v2487_v5 }
 0x46e   :  { %v2535_v16 = vadd.f32 %v2534_v10, %v2511_v9 }
 0x470   :  { %v2559_v19 = vadd.f32 %v2558_v17, %v2535_v16 }
 0x472   :  { %v2581_v22 = vadd.f32 %v2580_v20, %v2559_v19 }
 0x474   :  { %v2584_v25 = vadd.f32 %v2581_v22, %v2275_v21 }
 0x476   :  { %v2587_v24 = vrot.slane %v2584_v25, 4 }
 0x478   :  { %v2588_v27 = vsel %vm116_vm0, %v2583_v26, %v2587_v24 }
 0x479   :  { %2591 = vst [vmem:[#allocation11 + $0x8] sm:$0xff] %v2588_v27 }
 0x47a   :  { %2604 = dma.vmem_to_hbm [thread:$0]  %s2597_s8, 256, %s2599_s13, [#allocation4], %s2790_s9, %s2790_s9, %s2791_s10  }
 0x47b   :  { %2787 = dma.done.wait [#allocation4], 256  }
 0x47c   :  { %2788 = vsyncadd [#allocation4], 4294967040 }
 0x47d   :  { %2609 = vsyncpa [#allocation3], 1 }
 0x47e   :  { %2610 = vsyncpa [#allocation6], 1 }
 0x47f   :  { %2611 = vsyncpa [#allocation9], 1 }
 0x480   :  { %2612 = vsyncpa [#allocation4], 1 }

</bundles_post_ra>
